<compile_context>
chip_gen: v6e
topology: v6e:2x2x1
jax: 0.10.0
libtpu: 0.0.40
codegen_flags: <defaults>
</compile_context>

<pallas_src>
import jax
import jax.numpy as jnp
from jax.experimental import pallas as pl
from jax.experimental.pallas import tpu as pltpu


# --------------------------------------------------------------------------- #
# Kernel: pure memory-bound broadcast add.                                     #
# --------------------------------------------------------------------------- #
def _add_prompt_kernel(x_ref, prompt_ref, o_ref):
    # x_ref: (nb, lb)    prompt_ref: (1, lb)    o_ref: (nb, lb)
    o_ref[...] = x_ref[...] + prompt_ref[...]


# --------------------------------------------------------------------------- #
# Block-size heuristic (memory-bound elementwise op).                          #
# --------------------------------------------------------------------------- #
def _choose_blocks(n_rows, n_lanes, itemsize, target_bytes):
    """Pick (batch_block, lane_block) honoring the (8, 128) / full-dim rules."""
    # Lane (last-dim) block: full extent if it fits the target; otherwise the
    # largest 128-multiple divisor of n_lanes not exceeding the target.
    if n_lanes * itemsize <= target_bytes or n_lanes % 128 != 0:
        lb = n_lanes
    else:
        lb = n_lanes
        max_lanes = max(128, (target_bytes // itemsize) // 128 * 128)
        for cand in range(min(max_lanes, n_lanes), 0, -128):
            if n_lanes % cand == 0:
                lb = cand
                break
    # Batch (sublane) block: as many rows as fit the target, with the block
    # either a multiple of 8 (and dividing n_rows) or the full batch dim.
    row_bytes = lb * itemsize
    want = max(1, target_bytes // row_bytes)
    if want >= n_rows:
        nb = n_rows
    else:
        nb = n_rows  # fallback: full batch dim is always layout-legal
        cand = min(want, n_rows) // 8 * 8
        while cand >= 8:
            if n_rows % cand == 0:
                nb = cand
                break
            cand -= 8
    return nb, lb


# --------------------------------------------------------------------------- #
# Wrapper.                                                                     #
# --------------------------------------------------------------------------- #
def _border_mask(H, W, patch_size, prompt_size, dtype):
    """(H, W) mask: 1 on the prompt border of every patch tile, 0 inside."""
    hh = jnp.arange(H, dtype=jnp.int32) % patch_size
    ww = jnp.arange(W, dtype=jnp.int32) % patch_size
    hb = (hh < prompt_size) | (hh >= patch_size - prompt_size)
    wb = (ww < prompt_size) | (ww >= patch_size - prompt_size)
    return (hb[:, None] | wb[None, :]).astype(dtype)


def patch_prompter_forward(x, patch, *, patch_size, prompt_size,
                           target_block_bytes=2 * 1024 * 1024):
    """x: (N, C, H, W); patch: (1, C, H, W).  Returns x + patch * mask."""
    N, C, H, W = x.shape
    assert patch.shape == (1, C, H, W)
    assert H % patch_size == 0 and W % patch_size == 0
    assert patch_size >= 2 * prompt_size, "patch_size must be >= 2 * prompt_size"

    L = C * H * W

    # One-time masked prompt (N x smaller than the batch tensor).
    mask = _border_mask(H, W, patch_size, prompt_size, x.dtype)
    prompt = (patch.astype(x.dtype) * mask[None, None, :, :]).reshape(1, L)

    # Lane-dense, contiguous 2-D view of the batch tensor.
    x2 = x.reshape(N, L)

    nb, lb = _choose_blocks(N, L, jnp.dtype(x.dtype).itemsize, target_block_bytes)
    # Lane-block axis OUTER, batch-block axis INNER: the prompt's block index
    # is constant across the inner loop, so its DMA is skipped on repeats.
    grid = (L // lb, N // nb)

    out2 = pl.pallas_call(
        _add_prompt_kernel,
        out_shape=jax.ShapeDtypeStruct((N, L), x.dtype),
        grid_spec=pltpu.PrefetchScalarGridSpec(
            num_scalar_prefetch=0,
            grid=grid,
            in_specs=[
                pl.BlockSpec((nb, lb), lambda j, i: (i, j)),
                pl.BlockSpec((1, lb), lambda j, i: (0, j)),   # shared prompt row
            ],
            out_specs=pl.BlockSpec((nb, lb), lambda j, i: (i, j)),
        ),
        compiler_params=pltpu.CompilerParams(
            dimension_semantics=("parallel", "parallel")),
    )(x2, prompt)

    return out2.reshape(N, C, H, W)


# --------------------------------------------------------------------------- #
# Pure-JAX reference mirroring the PyTorch forward.                            #
# --------------------------------------------------------------------------- #
def reference_forward(x, patch, *, patch_size, prompt_size):
    _, C, H, W = x.shape
    fg_size = patch_size - 2 * prompt_size
    fg = jnp.zeros((1, C, fg_size, fg_size), x.dtype)
    fg = jnp.pad(
        fg,
        ((0, 0), (0, 0), (prompt_size, prompt_size), (prompt_size, prompt_size)),
        constant_values=1.0,
    )
    mask = jnp.tile(fg, (1, 1, H // patch_size, W // patch_size))
    return x + patch * mask


if __name__ == "__main__":
    # Small shapes consistent with the module: image_size=16, patch_size=8,
    # prompt_size=2 (-> fg_size=4), batch=2, channels=3 (RGB, hardcoded in
    # the PyTorch module).
    batch, channels, image_size = 2, 3, 16
    patch_size, prompt_size = 8, 2

    key = jax.random.PRNGKey(0)
    kx, kp = jax.random.split(key)
    x = jax.random.normal(kx, (batch, channels, image_size, image_size), jnp.float32)
    # Deterministic stand-in for nn.Parameter(torch.randn([1, 3, S, S]))
    patch = jax.random.normal(kp, (1, channels, image_size, image_size), jnp.float32)

    out = patch_prompter_forward(
        x, patch, patch_size=patch_size, prompt_size=prompt_size
    )
    out = jax.block_until_ready(out)

    ref = reference_forward(x, patch, patch_size=patch_size, prompt_size=prompt_size)
    assert out.shape == x.shape
    assert jnp.allclose(out, ref, atol=1e-6, rtol=1e-6)

    print("KERNEL_OK")
</pallas_src>

<mosaic_0001>
module attributes {stable_mosaic.version = 11 : i64} {
  func.func @_add_prompt_kernel(%arg0: i32, %arg1: i32, %arg2: memref<2x768xf32, #tpu.memory_space<vmem>>, %arg3: memref<1x768xf32, #tpu.memory_space<vmem>>, %arg4: memref<2x768xf32, #tpu.memory_space<vmem>>) attributes {dimension_semantics = [#tpu.dimension_semantics<parallel>, #tpu.dimension_semantics<parallel>], iteration_bounds = array<i64: 1, 1>, scalar_prefetch = 0 : i64, scratch_operands = 0 : i64, tpu.core_type = #tpu.core_type<tc>, window_params = [{transform_indices = @transform_0, window_bounds = array<i64: 2, 768>}, {transform_indices = @transform_1, window_bounds = array<i64: 1, 768>}, {transform_indices = @transform_2, window_bounds = array<i64: 2, 768>}]} {
    %c0 = arith.constant 0 : index
    %c0_0 = arith.constant 0 : index
    %0 = vector.load %arg2[%c0, %c0_0] : memref<2x768xf32, #tpu.memory_space<vmem>>, vector<2x768xf32>
    %c0_1 = arith.constant 0 : index
    %c0_2 = arith.constant 0 : index
    %1 = vector.load %arg3[%c0_1, %c0_2] : memref<1x768xf32, #tpu.memory_space<vmem>>, vector<1x768xf32>
    %2 = vector.broadcast %1 : vector<1x768xf32> to vector<2x768xf32>
    %3 = arith.addf %0, %2 : vector<2x768xf32>
    %c0_3 = arith.constant 0 : index
    %c0_4 = arith.constant 0 : index
    %4 = vector.load %arg4[%c0_3, %c0_4] : memref<2x768xf32, #tpu.memory_space<vmem>>, vector<2x768xf32>
    tpu.vector_store %arg4[%c0_3, %c0_4], %3 {strides = array<i32>} : memref<2x768xf32, #tpu.memory_space<vmem>>, vector<2x768xf32>,
    return
  }
  func.func @transform_0(%arg0: i32, %arg1: i32) -> (i32, i32) {
    %c0_i32 = arith.constant 0 : i32
    return %arg1, %arg0 : i32, i32
  }
  func.func @transform_1(%arg0: i32, %arg1: i32) -> (i32, i32) {
    %c0_i32 = arith.constant 0 : i32
    %c0_i32_0 = arith.constant 0 : i32
    return %c0_i32, %arg0 : i32, i32
  }
  func.func @transform_2(%arg0: i32, %arg1: i32) -> (i32, i32) {
    %c0_i32 = arith.constant 0 : i32
    return %arg1, %arg0 : i32, i32
  }
}

</mosaic_0001>

<bundles_post_ra>
// kernel: tpu_custom_call.1
= control target key start
LH: loop header
LB: loop body
LE: loop exit
PB: predicated region body
PF: predicated region fallthrough
CT: control target
= control target key end

     0   :  { %7 = vsyncpa [#allocation3], 0  ;;  %s209_s0 = inlined_call_operand.hbm [shape: f32[2,768], index: 0, kind: input, shape index: {}]   ;;  %s210_s1 = inlined_call_operand.hbm [shape: f32[1,768], index: 1, kind: input, shape index: {}]   ;;  %s211_s2 = inlined_call_operand.hbm [shape: f32[2,768], index: 2, kind: output, shape index: {}]  }
   0x1   :  { %8 = vsyncpa [#allocation6], 0 }
   0x2   :  { %9 = vsyncpa [#allocation4], 0  ;;  %s181_s9 = smov [#allocation2]   ;;  %s182_s11 = smov [#allocation5]  }
   0x3   :  { %s16_s10 = sshll.u32 %s181_s9, 4  ;;  %s26_s12 = sshll.u32 %s182_s11, 4  ;;  %s17_s10 = int_to_ptr.vmem [resolvable:$true] %s16_s10  ;;  %s27_s12 = int_to_ptr.vmem [resolvable:$true] %s26_s12 }
   0x4   :  { %s123_s13 = scalar_lea.vmem %s17_s10, 192  ;;  %p128_p1 = scmp.lt.s32.totalorder %s17_s10, %s17_s10 }
   0x5   :  { %p124_p0 = scmp.ne.s32.totalorder %s17_s10, %s123_s13  ;;  %p129_p2 = scmp.lt.s32.totalorder %s123_s13, %s123_s13 }
   0x7   :  { %p130_p3 = por %p129_p2, %p128_p1 }
   0x9   :  { %p131_p4 = pnand %p130_p3, %p124_p0 }
   0xb   :  { %134 = shalt.err (!%p131_p4)
}
   0xc   :  { %19 = dma.hbm_to_vmem [thread:$0]  %s209_s0, 192, %s17_s10, [#allocation3]  }
   0xd   :  { %s143_s16 = scalar_lea.vmem %s27_s12, 96  ;;  %p148_p6 = scmp.lt.s32.totalorder %s27_s12, %s27_s12 }
   0xe   :  { %p144_p5 = scmp.ne.s32.totalorder %s27_s12, %s143_s16  ;;  %p149_p7 = scmp.lt.s32.totalorder %s143_s16, %s143_s16 }
  0x10   :  { %p150_p8 = por %p149_p7, %p148_p6 }
  0x12   :  { %p151_p9 = pnand %p150_p8, %p144_p5 }
  0x14   :  { %154 = shalt.err (!%p151_p9)
}
  0x15   :  { %29 = dma.hbm_to_vmem [thread:$0]  %s210_s1, 96, %s27_s12, [#allocation6]  }
  0x16   :  { %175 = dma.done.wait [#allocation3], 192  }
  0x17   :  { %176 = vsyncadd [#allocation3], 4294967104 }
  0x18   :  { %177 = dma.done.wait [#allocation6], 96  }
  0x19   :  { %178 = vsyncadd [#allocation6], 4294967200  ;;  %v40_v0 = vlaneseq  ;;  %v183_v1 = vmov 1983009808   ;;  %v38_v11 = vld [vmem:[#allocation5] sm:$0x3f] }
  0x1a   :  { %v67_v2 = vunpack.c.l.s4 %v183_v1  ;;  %v37_v24 = vld [vmem:[#allocation2 + $0x8] sm:$0xf]  ;;  %v36_v25 = vld [vmem:[#allocation2] sm:$0xff]  ;;  %s184_s0 = smov [#allocation7]  }
  0x1b   :  { %v41_v3 = vshrl.u32 %v40_v0, 7  ;;  %s101_s1 = sshll.u32 %s184_s0, 4  ;;  %s102_s1 = int_to_ptr.vmem [resolvable:$true] %s101_s1 }
  0x1c   :  { %v68_v4 = vunpack.c.0.s8 %v67_v2  ;;  %s155_s19 = scalar_lea.vmem %s102_s1, 192  ;;  %p160_p11 = scmp.lt.s32.totalorder %s102_s1, %s102_s1 }
  0x1d   :  { %v42_v5 = vsub.s32 0, %v41_v3  ;;  %v46_v6 = vsub.s32 1, %v41_v3  ;;  %v50_v7 = vsub.s32 2, %v41_v3  ;;  %v54_v8 = vsub.s32 3, %v41_v3  ;;  %p156_p10 = scmp.ne.s32.totalorder %s102_s1, %s155_s19  ;;  %p161_p12 = scmp.lt.s32.totalorder %s155_s19, %s155_s19 }
  0x1e   :  { %v58_v9 = vsub.s32 4, %v41_v3  ;;  %v62_v10 = vsub.s32 5, %v41_v3  ;;  %v71_v12 = vsub.s32 %v68_v4, %v41_v3 }
  0x1f   :  { %v43_v13 = vrot.slane %v38_v11, %v42_v5  ;;  %v47_v14 = vrot.slane %v38_v11, %v46_v6  ;;  %v51_v15 = vrot.slane %v38_v11, %v50_v7  ;;  %v55_v16 = vrot.slane %v38_v11, %v54_v8  ;;  %p162_p13 = por %p161_p12, %p160_p11 }
  0x20   :  { %v59_v17 = vrot.slane %v38_v11, %v58_v9  ;;  %v63_v18 = vrot.slane %v38_v11, %v62_v10 }
  0x21   :  { %v64_v19 = vcombine.low %v43_v13, %v47_v14  ;;  %v65_v20 = vcombine.low %v51_v15, %v55_v16  ;;  %p163_p0 = pnand %p162_p13, %p156_p10 }
  0x22   :  { %v81_v21 = vcombine.low %v59_v17, %v63_v18 }
  0x23   :  { %v72_v22 = vrot.slane %v64_v19, %v71_v12  ;;  %v79_v23 = vrot.slane %v65_v20, %v71_v12 }
  0x24   :  { %v88_v26 = vrot.slane %v81_v21, %v71_v12 }
  0x25   :  { %v80_v27 = vcombine.low %v72_v22, %v79_v23 }
  0x26   :  { %v92_v28 = vadd.f32 %v88_v26, %v37_v24 }
  0x27   :  { %v91_v29 = vadd.f32 %v80_v27, %v36_v25 }
  0x28   :  { %94 = vst [vmem:[#allocation7 + $0x8] sm:$0xf] %v92_v28 }
  0x29   :  { %93 = vst [vmem:[#allocation7] sm:$0xff] %v91_v29 }
  0x2a   :  { %166 = shalt.err (!%p163_p0)
}
  0x2b   :  { %104 = dma.vmem_to_hbm [thread:$0]  %s102_s1, 192, %s211_s2, [#allocation4]  }
  0x2c   :  { %179 = dma.done.wait [#allocation4], 192  }
  0x2d   :  { %180 = vsyncadd [#allocation4], 4294967104 }
  0x2e   :  { %108 = vsyncpa [#allocation3], 1 }
  0x2f   :  { %109 = vsyncpa [#allocation6], 1 }
  0x30   :  { %110 = vsyncpa [#allocation4], 1 }

</bundles_post_ra>
